<compile_context>
chip_gen: v7x
topology: tpu7x:2x2x1
jax: 0.10.0
libtpu: 0.0.40
codegen_flags: <defaults>
</compile_context>

<pallas_src>
import math

import jax
import jax.numpy as jnp
from jax import lax
from jax.experimental import pallas as pl
from jax.experimental.pallas import tpu as pltpu

_LANE = 128
_SUBLANE = 16                      # multiple of 8; safe for packed bf16 too
_MIN_KERNEL_ELEMS = 100_000        # below this, fused XLA wins on launch cost
_MAX_LANE_DENSE_W = 8192           # cap on repacked row width
_TARGET_TILE_BYTES = 6 << 20       # per streamed input tile (amortizes 0.35us/step)
_TARGET_BLOCKS = 4                 # keep >=4 grid steps for v7x's 2 TensorCores


def _round_up(x, m):
    return ((x + m - 1) // m) * m


def _cdiv(a, b):
    return -(-a // b)


def _wbce_partials(x2d, t2d, *, hard_labels=False, max_tile_rows=None):
    """Per-column sums of t*log(x), (1-t)*log(1-x) and t over an (R, W) layout."""
    R, W = x2d.shape
    isx = jnp.dtype(x2d.dtype).itemsize
    ist = jnp.dtype(t2d.dtype).itemsize

    # Generation-aware VMEM budget (v7x has only 64 MiB per TensorCore).
    try:
        vmem_cap = int(pltpu.get_tpu_info().vmem_capacity_bytes)
    except Exception:
        vmem_cap = 64 << 20        # conservative default = v7x per-TC VMEM

    budget = min(int(0.60 * vmem_cap), 80 << 20)           # working-set budget
    tile_bytes = max(1 << 20, min(budget // 4, _TARGET_TILE_BYTES))
    row_bytes = max(W * max(isx, ist), 1)

    if R <= _SUBLANE:
        tm = R                     # single full-height block (always legal)
    else:
        tm = max(_SUBLANE, ((tile_bytes // row_bytes) // _SUBLANE) * _SUBLANE)
        # >= _TARGET_BLOCKS grid steps so the "parallel" axis can shard across
        # v7x's two TensorCores and the DMA pipeline stays busy.
        tm = min(tm, max(_SUBLANE, _round_up(_cdiv(R, _TARGET_BLOCKS), _SUBLANE)))
        if max_tile_rows is not None:
            tm = min(tm, max(_SUBLANE, (max_tile_rows // _SUBLANE) * _SUBLANE))
        tm = min(tm, _round_up(R, _SUBLANE))

    num_blocks = _cdiv(R, tm)
    needs_mask = (R % tm) != 0     # last block overhangs -> mask rows in-kernel

    def kernel(x_ref, t_ref, a_ref, b_ref, s_ref):
        x = x_ref[...].astype(jnp.float32)   # cast in-vreg (VPU slack is free)
        t = t_ref[...].astype(jnp.float32)
        if hard_labels:
            # One log per element (valid only for hard {0,1} labels).
            pos = t > 0.5
            lp = jnp.maximum(jnp.log(jnp.where(pos, x, 1.0 - x)), -100.0)
            a = jnp.where(pos, lp, 0.0)
            b = jnp.where(pos, 0.0, lp)
            ts = jnp.where(pos, 1.0, 0.0)
        else:
            # Clamp like torch BCE (log >= -100); zero-padded elements (x=0,
            # t=0) then contribute exactly 0 to all three partials.
            a = t * jnp.maximum(jnp.log(x), -100.0)
            b = (1.0 - t) * jnp.maximum(jnp.log(1.0 - x), -100.0)
            ts = t
        if needs_mask:
            # Mask rows past R.  Must use jnp.where (not multiply): the
            # overhang VMEM region is undefined and log(garbage) may be NaN.
            rows = (lax.broadcasted_iota(jnp.int32, (tm, W), 0)
                    + pl.program_id(0) * tm)
            m = rows < R
            a = jnp.where(m, a, 0.0)
            b = jnp.where(m, b, 0.0)
            ts = jnp.where(m, ts, 0.0)
        a_ref[...] = jnp.sum(a, axis=0).reshape(a_ref.shape)
        b_ref[...] = jnp.sum(b, axis=0).reshape(b_ref.shape)
        s_ref[...] = jnp.sum(ts, axis=0).reshape(s_ref.shape)

    # 2 streamed inputs x double buffering + 3 tiny lane-dense outputs.
    needed = 2 * tm * W * (isx + ist) + 3 * 2 * W * 4
    vmem_limit = min(max(int(1.3 * needed) + (4 << 20), 24 << 20),
                     int(0.62 * vmem_cap))

    out_sds = jax.ShapeDtypeStruct((num_blocks, 1, W), jnp.float32)
    out_spec = pl.BlockSpec((1, 1, W), lambda i: (i, 0, 0))
    pa, pb, ps = pl.pallas_call(
        kernel,
        out_shape=(out_sds, out_sds, out_sds),
        grid_spec=pltpu.PrefetchScalarGridSpec(
            num_scalar_prefetch=0,
            grid=(num_blocks,),
            in_specs=[
                pl.BlockSpec((tm, W), lambda i: (i, 0)),
                pl.BlockSpec((tm, W), lambda i: (i, 0)),
            ],
            out_specs=[out_spec, out_spec, out_spec],
        ),
        compiler_params=pltpu.CompilerParams(
            dimension_semantics=("parallel",),
            vmem_limit_bytes=int(vmem_limit),
        ),
    )(x2d, t2d)

    # Tiny final reduction over blocks in plain JAX.
    return (jnp.sum(pa, axis=(0, 1)),
            jnp.sum(pb, axis=(0, 1)),
            jnp.sum(ps, axis=(0, 1)))


def _wbce_reference(sigmoid_x, targets, pos_weight, weight, size_average,
                    reduce, dynamic_pos_weight):
    """Pure-JAX path (tiny problems, reduce=False, non-per-class weight)."""
    x = sigmoid_x.astype(jnp.float32)
    t = targets.astype(jnp.float32)
    n = x.shape[0]
    if dynamic_pos_weight:
        counts = jnp.sum(t, axis=0)
        pw = (n - counts) / (counts + 1e-05)
    else:
        pw = jnp.asarray(pos_weight, jnp.float32)
    log_x = jnp.maximum(jnp.log(x), -100.0)
    log_1mx = jnp.maximum(jnp.log(1.0 - x), -100.0)
    loss = -pw * t * log_x - (1.0 - t) * log_1mx
    if weight is not None:
        loss = loss * jnp.asarray(weight, jnp.float32)
    if not reduce:
        return loss
    return jnp.mean(loss) if size_average else jnp.sum(loss)


def weighted_bce_loss_pallas(sigmoid_x, targets, pos_weight=1.0, weight=None,
                             size_average=True, reduce=True,
                             dynamic_pos_weight=False, hard_labels=False,
                             min_kernel_elems=_MIN_KERNEL_ELEMS,
                             max_tile_rows=None):
    """Pallas equivalent of weighted_binary_cross_entropy."""
    if sigmoid_x.shape != targets.shape:
        raise ValueError(
            'Target size ({}) must be the same as input size ({})'.format(
                targets.shape, sigmoid_x.shape))
    if sigmoid_x.ndim != 2:
        raise ValueError('expected [N, C] inputs, got {}'.format(sigmoid_x.shape))
    N, C = sigmoid_x.shape

    # Per-class weight (size 1 or C) can be folded in the wrapper; anything
    # else (e.g. per-element weight) takes the fused-XLA fallback.
    weight_c = None
    if weight is not None:
        w_arr = jnp.asarray(weight, jnp.float32).reshape(-1)
        if w_arr.size == 1:
            weight_c = jnp.broadcast_to(w_arr, (C,))
        elif w_arr.size == C:
            weight_c = w_arr

    use_kernel = (reduce and N * C >= min_kernel_elems
                  and (weight is None or weight_c is not None))
    if not use_kernel:
        # TODO(synk): reduce=False (per-element loss map) stays on the fused
        # XLA path; a kernel adds nothing for a pure elementwise output.
        return _wbce_reference(sigmoid_x, targets, pos_weight, weight,
                               size_average, reduce, dynamic_pos_weight)

    # ---- layout selection ----
    W = (C * _LANE) // math.gcd(C, _LANE)            # lcm(C, 128)
    if C % _LANE != 0 and W <= _MAX_LANE_DENSE_W:
        # Lane-dense repack: fold W//C consecutive rows into one W-wide row.
        # The reshape of the contiguous [N, C] buffer is free (bitcast);
        # column w of the wide layout is class (w % C).
        flat = N * C
        x_flat = sigmoid_x.reshape(-1)
        t_flat = targets.reshape(-1)
        if flat % W != 0:
            # Only remaining HBM copy; triggers only when N is not a multiple
            # of W//C.  Zero padding contributes exactly 0 (thanks to the
            # -100 clamp), so no extra masking is needed for it.
            pad = W - flat % W
            x_flat = jnp.pad(x_flat, (0, pad))
            t_flat = jnp.pad(t_flat, (0, pad))
        x2d = x_flat.reshape(-1, W)
        t2d = t_flat.reshape(-1, W)
        fold = W // C
    else:
        # C already a multiple of 128 (lane-dense as-is), or lcm(C, 128) too
        # wide to repack (C >= 65): keep the natural [N, C] layout.
        x2d, t2d = sigmoid_x, targets
        W = C
        fold = 1

    a_w, b_w, s_w = _wbce_partials(x2d, t2d, hard_labels=hard_labels,
                                   max_tile_rows=max_tile_rows)
    # Fold the W lane-columns back onto the C classes (column w -> class w % C).
    a_c = a_w.reshape(fold, C).sum(axis=0)
    b_c = b_w.reshape(fold, C).sum(axis=0)

    if dynamic_pos_weight:
        counts = s_w.reshape(fold, C).sum(axis=0)    # fused per-class positives
        pw_c = (N - counts) / (counts + 1e-05)
    else:
        pw_arr = jnp.asarray(pos_weight, jnp.float32).reshape(-1)
        pw_c = (jnp.broadcast_to(pw_arr, (C,)) if pw_arr.size == 1
                else pw_arr.reshape(C))

    per_class = -pw_c * a_c - b_c
    if weight_c is not None:
        per_class = per_class * weight_c
    total = jnp.sum(per_class)
    if size_average:
        return total / (N * C)
    return total


class WeightedBCELoss:
    """JAX/Pallas mirror of the PyTorch WeightedBCELoss module."""

    def __init__(self, pos_weight=1.0, weight=None, PosWeightIsDynamic=False,
                 WeightIsDynamic=False, size_average=True, reduce=True,
                 hard_labels=False):
        self.pos_weight = pos_weight
        self.weight = weight
        self.PosWeightIsDynamic = PosWeightIsDynamic
        self.WeightIsDynamic = WeightIsDynamic   # API parity (unused, as in torch)
        self.size_average = size_average
        self.reduce = reduce
        self.hard_labels = hard_labels

    def __call__(self, inputs, targets):
        return weighted_bce_loss_pallas(
            inputs, targets, pos_weight=self.pos_weight, weight=self.weight,
            size_average=self.size_average, reduce=self.reduce,
            dynamic_pos_weight=self.PosWeightIsDynamic,
            hard_labels=self.hard_labels)


def _torch_ref(x, t, pw, weight=None, size_average=True):
    x = x.astype(jnp.float32)
    t = t.astype(jnp.float32)
    loss = -pw * t * jnp.log(x) - (1.0 - t) * jnp.log(1.0 - x)
    if weight is not None:
        loss = loss * jnp.asarray(weight, jnp.float32)
    return jnp.mean(loss) if size_average else jnp.sum(loss)


if __name__ == "__main__":
    key = jax.random.PRNGKey(0)
    ks = jax.random.split(key, 12)

    def mk(kx, kt, n, c, dtype=jnp.float32, lo=0.01, hi=0.99):
        x = jax.random.uniform(kx, (n, c), jnp.float32,
                               minval=lo, maxval=hi).astype(dtype)
        t = (jax.random.uniform(kt, (n, c), jnp.float32) > 0.5).astype(dtype)
        return x, t

    # Case 0: tiny problem -> pure-JAX gate (default min_kernel_elems).
    x0, t0 = mk(ks[0], ks[1], 8, 32)
    loss0 = jax.block_until_ready(WeightedBCELoss()(x0, t0))
    assert jnp.allclose(loss0, _torch_ref(x0, t0, 1.0), rtol=1e-5, atol=1e-6)

    # Case 1: default kernel gate via the module class; C multiple of 128
    # (already lane-dense), 4 parallel grid blocks, vector pos_weight.
    x1, t1 = mk(ks[2], ks[3], 896, 128)
    pw1 = jnp.full((1, 128), 2.0, jnp.float32)
    loss1 = jax.block_until_ready(WeightedBCELoss(pos_weight=pw1)(x1, t1))
    assert jnp.allclose(loss1, _torch_ref(x1, t1, pw1), rtol=1e-5, atol=1e-6)

    # Case 2: lane-dense repack (C=32 -> W=128) with misaligned N (flat-tail
    # pad) + forced small tiles (multi-block grid + in-kernel row mask).
    x2, t2 = mk(ks[4], ks[5], 250, 32)
    pw2 = (1.0 + jnp.arange(32, dtype=jnp.float32) / 32.0).reshape(1, 32)
    loss2 = jax.block_until_ready(weighted_bce_loss_pallas(
        x2, t2, pos_weight=pw2, min_kernel_elems=0, max_tile_rows=16))
    assert jnp.allclose(loss2, _torch_ref(x2, t2, pw2), rtol=1e-5, atol=1e-6)

    # Case 3: bf16 inputs, awkward C=17 (repacked to W=2176), scalar pw.
    x3, t3 = mk(ks[6], ks[7], 300, 17, dtype=jnp.bfloat16, lo=0.02, hi=0.98)
    loss3 = jax.block_until_ready(weighted_bce_loss_pallas(
        x3, t3, pos_weight=1.0, min_kernel_elems=0))
    assert jnp.allclose(loss3, _torch_ref(x3, t3, 1.0), rtol=1e-4, atol=1e-5)

    # Case 4: dynamic pos_weight -> column stats fused into the same pass.
    x4, t4 = mk(ks[8], ks[9], 512, 64)
    loss4 = jax.block_until_ready(weighted_bce_loss_pallas(
        x4, t4, dynamic_pos_weight=True, min_kernel_elems=0))
    counts4 = jnp.sum(t4, axis=0)
    pw4 = (512 - counts4) / (counts4 + 1e-05)
    assert jnp.allclose(loss4, _torch_ref(x4, t4, pw4), rtol=1e-5, atol=1e-6)

    # Case 5: per-class weight + sum reduction + hard-label single-log path.
    x5, t5 = mk(ks[10], ks[11], 256, 32)
    pw5 = jnp.full((32,), 1.5, jnp.float32)
    w5 = 0.5 + jnp.arange(32, dtype=jnp.float32) / 64.0
    loss5 = jax.block_until_ready(weighted_bce_loss_pallas(
        x5, t5, pos_weight=pw5, weight=w5, size_average=False,
        hard_labels=True, min_kernel_elems=0))
    ref5 = _torch_ref(x5, t5, pw5, weight=w5, size_average=False)
    assert jnp.allclose(loss5, ref5, rtol=1e-4, atol=1e-3)

    # Case 6: reduce=False falls back to the fused-XLA elementwise path.
    l6 = jax.block_until_ready(weighted_bce_loss_pallas(
        x0, t0, pos_weight=1.0, reduce=False))
    assert l6.shape == x0.shape

    print("KERNEL_OK")
</pallas_src>

<mosaic_0001>
module attributes {stable_mosaic.version = 11 : i64} {
  func.func @kernel(%arg0: i32, %arg1: memref<224x128xf32, #tpu.memory_space<vmem>>, %arg2: memref<224x128xf32, #tpu.memory_space<vmem>>, %arg3: memref<1x1x128xf32, #tpu.memory_space<vmem>>, %arg4: memref<1x1x128xf32, #tpu.memory_space<vmem>>, %arg5: memref<1x1x128xf32, #tpu.memory_space<vmem>>) attributes {dimension_semantics = [#tpu.dimension_semantics<parallel>], iteration_bounds = array<i64: 4>, scalar_prefetch = 0 : i64, scratch_operands = 0 : i64, tpu.core_type = #tpu.core_type<tc>, window_params = [{transform_indices = @transform_0, window_bounds = array<i64: 224, 128>}, {transform_indices = @transform_1, window_bounds = array<i64: 224, 128>}, {transform_indices = @transform_2, window_bounds = array<i64: 1, 1, 128>}, {transform_indices = @transform_3, window_bounds = array<i64: 1, 1, 128>}, {transform_indices = @transform_4, window_bounds = array<i64: 1, 1, 128>}]} {
    %c0 = arith.constant 0 : index
    %c0_0 = arith.constant 0 : index
    %0 = vector.load %arg1[%c0, %c0_0] : memref<224x128xf32, #tpu.memory_space<vmem>>, vector<224x128xf32>
    %c0_1 = arith.constant 0 : index
    %c0_2 = arith.constant 0 : index
    %1 = vector.load %arg2[%c0_1, %c0_2] : memref<224x128xf32, #tpu.memory_space<vmem>>, vector<224x128xf32>
    %2 = math.log %0 : vector<224x128xf32>
    %cst = arith.constant -1.000000e+02 : f32
    %3 = vector.broadcast %cst : f32 to vector<224x128xf32>
    %4 = arith.maximumf %2, %3 : vector<224x128xf32>
    %5 = arith.mulf %1, %4 : vector<224x128xf32>
    %cst_3 = arith.constant 1.000000e+00 : f32
    %6 = vector.broadcast %cst_3 : f32 to vector<224x128xf32>
    %7 = arith.subf %6, %1 : vector<224x128xf32>
    %cst_4 = arith.constant 1.000000e+00 : f32
    %8 = vector.broadcast %cst_4 : f32 to vector<224x128xf32>
    %9 = arith.subf %8, %0 : vector<224x128xf32>
    %10 = math.log %9 : vector<224x128xf32>
    %cst_5 = arith.constant -1.000000e+02 : f32
    %11 = vector.broadcast %cst_5 : f32 to vector<224x128xf32>
    %12 = arith.maximumf %10, %11 : vector<224x128xf32>
    %13 = arith.mulf %7, %12 : vector<224x128xf32>
    %cst_6 = arith.constant dense<0.000000e+00> : vector<128xf32>
    %14 = vector.multi_reduction <add>, %5, %cst_6 [0] : vector<224x128xf32> to vector<128xf32>
    %15 = vector.shape_cast %14 : vector<128xf32> to vector<1x1x128xf32>
    %c0_7 = arith.constant 0 : index
    %c0_8 = arith.constant 0 : index
    %c0_9 = arith.constant 0 : index
    %16 = vector.load %arg3[%c0_7, %c0_8, %c0_9] : memref<1x1x128xf32, #tpu.memory_space<vmem>>, vector<1x1x128xf32>
    tpu.vector_store %arg3[%c0_7, %c0_8, %c0_9], %15 {strides = array<i32>} : memref<1x1x128xf32, #tpu.memory_space<vmem>>, vector<1x1x128xf32>,
    %cst_10 = arith.constant dense<0.000000e+00> : vector<128xf32>
    %17 = vector.multi_reduction <add>, %13, %cst_10 [0] : vector<224x128xf32> to vector<128xf32>
    %18 = vector.shape_cast %17 : vector<128xf32> to vector<1x1x128xf32>
    %c0_11 = arith.constant 0 : index
    %c0_12 = arith.constant 0 : index
    %c0_13 = arith.constant 0 : index
    %19 = vector.load %arg4[%c0_11, %c0_12, %c0_13] : memref<1x1x128xf32, #tpu.memory_space<vmem>>, vector<1x1x128xf32>
    tpu.vector_store %arg4[%c0_11, %c0_12, %c0_13], %18 {strides = array<i32>} : memref<1x1x128xf32, #tpu.memory_space<vmem>>, vector<1x1x128xf32>,
    %cst_14 = arith.constant dense<0.000000e+00> : vector<128xf32>
    %20 = vector.multi_reduction <add>, %1, %cst_14 [0] : vector<224x128xf32> to vector<128xf32>
    %21 = vector.shape_cast %20 : vector<128xf32> to vector<1x1x128xf32>
    %c0_15 = arith.constant 0 : index
    %c0_16 = arith.constant 0 : index
    %c0_17 = arith.constant 0 : index
    %22 = vector.load %arg5[%c0_15, %c0_16, %c0_17] : memref<1x1x128xf32, #tpu.memory_space<vmem>>, vector<1x1x128xf32>
    tpu.vector_store %arg5[%c0_15, %c0_16, %c0_17], %21 {strides = array<i32>} : memref<1x1x128xf32, #tpu.memory_space<vmem>>, vector<1x1x128xf32>,
    return
  }
  func.func @transform_0(%arg0: i32) -> (i32, i32) {
    %c0_i32 = arith.constant 0 : i32
    %c0_i32_0 = arith.constant 0 : i32
    return %arg0, %c0_i32 : i32, i32
  }
  func.func @transform_1(%arg0: i32) -> (i32, i32) {
    %c0_i32 = arith.constant 0 : i32
    %c0_i32_0 = arith.constant 0 : i32
    return %arg0, %c0_i32 : i32, i32
  }
  func.func @transform_2(%arg0: i32) -> (i32, i32, i32) {
    %c0_i32 = arith.constant 0 : i32
    %c0_i32_0 = arith.constant 0 : i32
    %c0_i32_1 = arith.constant 0 : i32
    return %arg0, %c0_i32, %c0_i32_0 : i32, i32, i32
  }
  func.func @transform_3(%arg0: i32) -> (i32, i32, i32) {
    %c0_i32 = arith.constant 0 : i32
    %c0_i32_0 = arith.constant 0 : i32
    %c0_i32_1 = arith.constant 0 : i32
    return %arg0, %c0_i32, %c0_i32_0 : i32, i32, i32
  }
  func.func @transform_4(%arg0: i32) -> (i32, i32, i32) {
    %c0_i32 = arith.constant 0 : i32
    %c0_i32_0 = arith.constant 0 : i32
    %c0_i32_1 = arith.constant 0 : i32
    return %arg0, %c0_i32, %c0_i32_0 : i32, i32, i32
  }
}

</mosaic_0001>

<bundles_post_ra>
// kernel: tpu_custom_call.1
= control target key start
LH: loop header
LB: loop body
LE: loop exit
PB: predicated region body
PF: predicated region fallthrough
CT: control target
= control target key end

     0   :  { %10 = vsyncpa [#allocation3], 0  ;;  %s1960_s0 = inlined_call_operand.hbm [shape: f32[896,128], index: 0, kind: input, shape index: {}]   ;;  %s1961_s1 = inlined_call_operand.hbm [shape: f32[896,128], index: 1, kind: input, shape index: {}]   ;;  %s1962_s2 = inlined_call_operand.hbm [shape: f32[4,1,128], index: 2, kind: output, shape index: {0}]   ;;  %s1963_s3 = inlined_call_operand.hbm [shape: f32[4,1,128], index: 3, kind: output, shape index: {1}]   ;;  %s1964_s4 = inlined_call_operand.hbm [shape: f32[4,1,128], index: 4, kind: output, shape index: {2}]  }
   0x1   :  { %12 = vsyncpa [#allocation3 + $0x1], 0 }
   0x2   :  { %13 = vsyncpa [#allocation6], 0 }
   0x3   :  { %15 = vsyncpa [#allocation6 + $0x1], 0 }
   0x4   :  { %16 = vsyncpa [#allocation4], 0 }
   0x5   :  { %18 = vsyncpa [#allocation4 + $0x1], 0 }
   0x6   :  { %19 = vsyncpa [#allocation9], 0 }
   0x7   :  { %21 = vsyncpa [#allocation9 + $0x1], 0  ;;  %s1315_s15 = smov 0   ;;  %s1317_s16 = smov 0  }
   0x8   :  { %s1319_s17 = smov 0   ;;  %s1321_s18 = smov 0  }
   0x9 LB: > { %s1336_s19 = sadd.s32 4294967295, %s1281_s18   ;;  %s1966_s20 = sadd.s32 4294967294, %s1281_s18   ;;  %s1281_s18 = sphi %s1321_s18, %s2062_s18   ;;  %s1277_s17 = sphi %s1319_s17, %s2061_s17   ;;  %s1273_s16 = sphi %s1317_s16, %s2060_s16   ;;  %s1269_s15 = sphi %s1315_s15, %s2059_s15  }
   0xa   : > { %s1340_s21 = sadd.s32 1, %s1281_s18   ;;  %s34_s22 = sadd.s32 1, %s1277_s17 }
   0xb   : > { %s31_s23 = ssub.s32 %s1281_s18, %s1340_s21  ;;  %p41_p0 = scmp.ne.s32.totalorder %s1277_s17, %s1273_s16 }
   0xc   : > { %p32_p1 = scmp.eq.s32.totalorder %s31_s23, 0  ;;  %p42_p2 = scmp.eq.s32.totalorder %s1281_s18, 0 }
   0xd   : > { %p47_p3 = scmp.ne.s32.totalorder %s1273_s16, %s1269_s15  ;;  %p48_p4 = scmp.eq.s32.totalorder %s1336_s19, 0 }
   0xe   : > { %s1352_s24 = scalar_select %p32_p1, %s1277_s17, %s34_s22  }
   0xf   : > { %p43_p5 = por %p42_p2, %p41_p0  ;;  %p1354_p6 = por %p48_p4, %p47_p3 }
  0x10   : > { %p97_p7 = scmp.eq.s32.totalorder %s1336_s19, 3  ;;  %p103_p8 = scmp.eq.s32.totalorder %s1966_s20, 3 }
  0x11   : > { %s1994_s25 = scalar_select %p1354_p6, 1, 0 }
  0x12   : > { %p943_p9 = scmp.lt.s32.totalorder %s1281_s18, 4  ;;  %p1362_p10 = por %p97_p7, %p41_p0 }
  0x13   : > { %p1366_p11 = por %p103_p8, %p47_p3  ;;  %s1371_s28 = sand.u32 1, %s1277_s17  }
  0x14   : > { %s1995_s26 = scalar_select %p1362_p10, 1, 0 }
  0x15   : > { %s1996_s27 = scalar_select %p1366_p11, 1, 0 }
  0x16   : > { %s911_s29 = smul.u32 3584, %s1281_s18  ;;  %p1382_p12 = pnand %p943_p9, %p43_p5 }
  0x17   : > { %s913_s30 = smul.u32 224, %s1371_s28  ;;  %s176_s11 = scalar_lea.sflag [#allocation3], %s1371_s28 }
  0x18   : > { %s1380_s7 = scalar_lea.hbm %s1960_s0, %s911_s29  ;;  %p1093_p0 = pneg %p1382_p12 }
  0x19   : > { %s179_s9 = scalar_lea.vmem [#allocation2], %s913_s30  ;;  %s1091_s12 = scalar_lea.hbm %s1380_s7, 3584 }
  0x1a   : > { %s186_s10 = sshll.u32 %s179_s9, 4  ;;  %p1092_p13 = scmp.ne.s32.totalorder %s1380_s7, %s1091_s12  ;;  %s1388_s10 = int_to_ptr.vmem [resolvable:$true] %s186_s10 }
  0x1b   : > { %s1096_s22 = scalar_lea.hbm %s1960_s0, 14336  ;;  %p1097_p3 = scmp.lt.u32.totalorder %s1380_s7, %s1960_s0 }
  0x1c   : > { %p1094_p1 = pnand %p1093_p0, %p1092_p13  ;;  %p1098_p4 = scmp.lt.u32.totalorder %s1096_s22, %s1091_s12 }
  0x1d   : > { %p1100_p7 = scmp.lt.u32.totalorder %s1091_s12, %s1380_s7 }
  0x1e   : > { %p1095_p2 = pneg %p1094_p1  ;;  %p1099_p5 = por %p1098_p4, %p1097_p3 }
  0x20   : > { %p1101_p8 = por %p1100_p7, %p1099_p5 }
  0x22   : > { %p1102_p9 = pnand %p1101_p8, %p1095_p2 }
  0x24   : > { %1105 = shalt.err (!%p1102_p9)
}
  0x25   : > { %s1106_s6 = scalar_lea.vmem %s1388_s10, 3584  ;;  %s1283_s9 = smov [#allocation2]  }
  0x26   : > { %p1107_p13 = scmp.ne.s32.totalorder %s1388_s10, %s1106_s6  ;;  %s1111_s13 = sshll.u32 %s1283_s9, 4  ;;  %s1112_s13 = int_to_ptr.vmem [resolvable:$false] %s1111_s13 }
  0x27   : > { %s1113_s14 = scalar_lea.vmem %s1112_s13, 7168  ;;  %p1114_p10 = scmp.lt.s32.totalorder %s1388_s10, %s1112_s13 }
  0x28   : > { %p1109_p1 = pnand %p1107_p13, %p1093_p0  ;;  %p1115_p3 = scmp.lt.s32.totalorder %s1113_s14, %s1106_s6 }
  0x2a   : > { %p1110_p11 = pneg %p1109_p1  ;;  %p1116_p4 = por %p1115_p3, %p1114_p10 }
  0x2c   : > { %p1117_p5 = pnand %p1116_p4, %p1110_p11 }
  0x2e   : > { %1120 = shalt.err (!%p1117_p5)
}
  0x2f   : > { %s1284_s12 = smov 128   ;;  %s1285_s22 = smov 8  }
  0x30   : > { %929 = dma.hbm_to_vmem [thread:$0]  (!%p1382_p12), %s1380_s7, 3584, %s1388_s10, %s176_s11, %s1284_s12, %s1284_s12, %s1285_s22  }
  0x31   : > { %p905_p10 = scmp.ge.s32.totalorder %s1281_s18, 1  ;;  %p215_p11 = scmp.lt.s32.totalorder %s1281_s18, 5 }
  0x32   : > { %s1432_s9 = scalar_lea.hbm %s1961_s1, %s911_s29  ;;  %s200_s13 = scalar_lea.vmem [#allocation5], %s913_s30 }
  0x33   : > { %p1423_p2 = pnand %p905_p10, %p215_p11  ;;  %s207_s14 = sshll.u32 %s200_s13, 4  ;;  %s1436_s14 = int_to_ptr.vmem [resolvable:$true] %s207_s14 }
  0x34   : > { %s197_s7 = scalar_lea.sflag [#allocation6], %s1371_s28  ;;  %s1121_s10 = scalar_lea.hbm %s1432_s9, 3584 }
  0x35   : > { %p1122_p7 = scmp.ne.s32.totalorder %s1432_s9, %s1121_s10  ;;  %s1126_s29 = scalar_lea.hbm %s1961_s1, 14336 }
  0x36   : > { %p1127_p13 = scmp.lt.u32.totalorder %s1432_s9, %s1961_s1  ;;  %p1128_p1 = scmp.lt.u32.totalorder %s1126_s29, %s1121_s10 }
  0x37   : > { %p1124_p8 = pnand %p1122_p7, %p1093_p0  ;;  %p1130_p4 = scmp.lt.u32.totalorder %s1121_s10, %s1432_s9 }
  0x38   : > { %p1129_p3 = por %p1128_p1, %p1127_p13 }
  0x39   : > { %p1125_p9 = pneg %p1124_p8 }
  0x3a   : > { %p1131_p5 = por %p1130_p4, %p1129_p3 }
  0x3c   : > { %p1132_p10 = pnand %p1131_p5, %p1125_p9 }
  0x3e   : > { %1135 = shalt.err (!%p1132_p10)
}
  0x3f   : > { %s1136_s30 = scalar_lea.vmem %s1436_s14, 3584  ;;  %s1286_s13 = smov [#allocation5]  }
  0x40   : > { %p1137_p11 = scmp.ne.s32.totalorder %s1436_s14, %s1136_s30  ;;  %s1141_s11 = sshll.u32 %s1286_s13, 4  ;;  %s1142_s11 = int_to_ptr.vmem [resolvable:$false] %s1141_s11 }
  0x41   : > { %s1143_s20 = scalar_lea.vmem %s1142_s11, 7168  ;;  %p1144_p6 = scmp.lt.s32.totalorder %s1436_s14, %s1142_s11 }
  0x42   : > { %p1139_p7 = pnand %p1137_p11, %p1093_p0  ;;  %p1145_p13 = scmp.lt.s32.totalorder %s1143_s20, %s1136_s30 }
  0x44   : > { %p1140_p8 = pneg %p1139_p7  ;;  %p1146_p1 = por %p1145_p13, %p1144_p6 }
  0x46   : > { %p1147_p3 = pnand %p1146_p1, %p1140_p8 }
  0x48   : > { %1150 = shalt.err (!%p1147_p3)
}
  0x49   : > { %932 = dma.hbm_to_vmem [thread:$0]  (!%p1382_p12), %s1432_s9, 3584, %s1436_s14, %s197_s7, %s1284_s12, %s1284_s12, %s1285_s22  }
  0x4a   : > { %219 = sbr.rel (%p1423_p2) target bundleno = 255 (0xff), region = 28 }
  0x51   : > { %s1470_s10 = sand.u32 1, %s1273_s16   ;;  %p1999_p6 = scmp.ne.s32.totalorder %s1994_s25, 0 }
  0x52   : > { %s915_s5 = smul.u32 224, %s1470_s10  ;;  %s222_s29 = scalar_lea.sflag [#allocation3], %s1470_s10 }
  0x54   : > { %s1474_s8 = scalar_lea.vmem [#allocation2], %s915_s5 }
  0x55   : > { %1252 = dma.done.wait (%p1999_p6), %s222_s29, 3584  }
  0x56   : > { %1254 = vsyncadd (%p1999_p6), %s222_s29, 4294963712  ;;  %s231_s28 = scalar_lea.sflag [#allocation6], %s1470_s10  ;;  %s1481_s12 = scalar_lea.vmem [#allocation5], %s915_s5 }
  0x57   : > { %1256 = dma.done.wait (%p1999_p6), %s231_s28, 3584  }
  0x58   : > { %1258 = vsyncadd (%p1999_p6), %s231_s28, 4294963712  ;;  %v273_v0 = vld [vmem:[%s1474_s8] sm:$0xff]  ;;  %v274_v1 = vld [vmem:[%s1474_s8 + $0x8] sm:$0xff]  ;;  %s715_s25 = sand.u32 1, %s1336_s19   ;;  %s1816_s22 = sshll.u32 %s1336_s19, 4 }
  0x59   : > { %v1490_v2 = vld [vmem:[%s1474_s8 + $0x10] sm:$0xff]  ;;  %v469_v3 = vsub.f32 1.0, %v273_v0  ;;  %v470_v4 = vsub.f32 1.0, %v274_v1  ;;  %v1493_v5 = vld [vmem:[%s1474_s8 + $0x18] sm:$0xff]  ;;  %v1497_v7 = vld [vmem:[%s1474_s8 + $0x20] sm:$0xff]  ;;  %s264_s23 = scalar_lea.vmem [#allocation8], %s1470_s10  ;;  %s1827_s6 = scalar_lea.hbm %s1963_s3, %s1816_s22 }
  0x5a   : > { %v471_v6 = vsub.f32 1.0, %v1490_v2  ;;  %v472_v8 = vsub.f32 1.0, %v1493_v5  ;;  %v1501_v9 = vld [vmem:[%s1474_s8 + $0x28] sm:$0xff]  ;;  %v473_v10 = vsub.f32 1.0, %v1497_v7  ;;  %v1505_v11 = vld [vmem:[%s1474_s8 + $0x30] sm:$0xff]  ;;  %v1509_v13 = vld [vmem:[%s1474_s8 + $0x38] sm:$0xff] }
  0x5b   : > { %979 = vlog2.f32 %v469_v3  ;;  %v474_v12 = vsub.f32 1.0, %v1501_v9  ;;  %v475_v14 = vsub.f32 1.0, %v1505_v11  ;;  %v1513_v15 = vld [vmem:[%s1474_s8 + $0x40] sm:$0xff]  ;;  %v476_v16 = vsub.f32 1.0, %v1509_v13  ;;  %v1517_v18 = vld [vmem:[%s1474_s8 + $0x48] sm:$0xff]  ;;  %v1520_v19 = vld [vmem:[%s1474_s8 + $0x50] sm:$0xff] }
  0x5c   : > { %981 = vlog2.f32 %v470_v4  ;;  %v477_v21 = vsub.f32 1.0, %v1513_v15  ;;  %v1524_v22 = vld [vmem:[%s1474_s8 + $0x58] sm:$0xff]  ;;  %v1527_v24 = vld [vmem:[%s1474_s8 + $0x60] sm:$0xff]  ;;  %v1530_v25 = vld [vmem:[%s1474_s8 + $0x68] sm:$0xff]  ;;  %v478_v26 = vsub.f32 1.0, %v1517_v18  ;;  %v479_v27 = vsub.f32 1.0, %v1520_v19 }
  0x5d   : > { %983 = vlog2.f32 %v471_v6  ;;  %2000 = vst [vmem:[#allocation15_spill] sm:$0xff] %v1530_v25  ;;  %v1535_v28 = vld [vmem:[%s1481_s12] sm:$0xff]  ;;  %v1538_v29 = vld [vmem:[%s1481_s12 + $0x8] sm:$0xff]  ;;  %v480_v33 = vsub.f32 1.0, %v1524_v22  ;;  %v1542_v34 = vld [vmem:[%s1474_s8 + $0x70] sm:$0xff]  ;;  %v481_v37 = vsub.f32 1.0, %v1527_v24 }
  0x5e   : > { %985 = vlog2.f32 %v472_v8  ;;  %2001 = vst [vmem:[#allocation16_spill] sm:$0xff] %v1542_v34  ;;  %v1545_v35 = vld [vmem:[%s1474_s8 + $0x78] sm:$0xff]  ;;  %v1548_v36 = vld [vmem:[%s1474_s8 + $0x80] sm:$0xff]  ;;  %v1552_v40 = vld [vmem:[%s1474_s8 + $0x88] sm:$0xff]  ;;  %v441_v42 = vsub.f32 1.0, %v1535_v28  ;;  %v442_v43 = vsub.f32 1.0, %v1538_v29 }
  0x5f   : > { %987 = vlog2.f32 %v473_v10  ;;  %2002 = vst [vmem:[#allocation17_spill] sm:$0xff] %v1545_v35  ;;  %2003 = vst [vmem:[#allocation18_spill] sm:$0xff] %v1548_v36  ;;  %v1555_v41 = vld [vmem:[%s1481_s12 + $0x10] sm:$0xff]  ;;  %v482_v44 = vsub.f32 1.0, %v1530_v25  ;;  %v1564_v46 = vld [vmem:[%s1481_s12 + $0x18] sm:$0xff]  ;;  %v483_v52 = vsub.f32 1.0, %v1542_v34 }
  0x60   : > { %989 = vlog2.f32 %v474_v12  ;;  %2004 = vst [vmem:[#allocation19_spill] sm:$0xff] %v1552_v40  ;;  %v1561_v45 = vld [vmem:[%s1474_s8 + $0x90] sm:$0xff]  ;;  %v1567_v51 = vld [vmem:[%s1474_s8 + $0x98] sm:$0xff]  ;;  %v484_v53 = vsub.f32 1.0, %v1545_v35  ;;  %v485_v54 = vsub.f32 1.0, %v1548_v36  ;;  %v1573_v55 = vld [vmem:[%s1474_s8 + $0xa0] sm:$0xff] }
  0x61   : > { %991 = vlog2.f32 %v475_v14  ;;  %2005 = vst [vmem:[#allocation20_spill] sm:$0xff] %v1561_v45  ;;  %2006 = vst [vmem:[#allocation21_spill] sm:$0xff] %v1567_v51  ;;  %v1576_v56 = vld [vmem:[%s1481_s12 + $0x20] sm:$0xff]  ;;  %v443_v57 = vsub.f32 1.0, %v1555_v41  ;;  %v444_v61 = vsub.f32 1.0, %v1564_v46  ;;  %v486_v62 = vsub.f32 1.0, %v1552_v40 }
  0x62   : > { %993 = vlog2.f32 %v476_v16  ;;  %2007 = vst [vmem:[#allocation22_spill] sm:$0xff] %v1573_v55  ;;  %v487_v63 = vsub.f32 1.0, %v1561_v45  ;;  %v1589_v3 = vld [vmem:[%s1481_s12 + $0x28] sm:$0xff]  ;;  %v445_v14 = vsub.f32 1.0, %v1576_v56  ;;  %v488_v16 = vsub.f32 1.0, %v1567_v51  ;;  %v1650_v45 = vld [vmem:[%s1481_s12 + $0x70] sm:$0xff] }
  0x63   : > { %995 = vlog2.f32 %v273_v0  ;;  %v1583_v0 = vld [vmem:[%s1474_s8 + $0xa8] sm:$0xff]  ;;  %v1656_v40 = vld [vmem:[%s1481_s12 + $0x80] sm:$0xff]  ;;  %s745_s9 = sshll.u32 %s264_s23, 4  ;;  %s1838_s30 = scalar_lea.sflag [#allocation9], %s715_s25  ;;  %s1829_s9 = int_to_ptr.vmem [resolvable:$true] %s745_s9 }
  0x64   : > { %997 = vlog2.f32 %v477_v21  ;;  %2008 = vst [vmem:[#allocation23_spill] sm:$0xff] %v1583_v0  ;;  %v1597_v21 = vld [vmem:[%s1474_s8 + $0xb8] sm:$0xff]  ;;  %v1647_v51 = vld [vmem:[%s1481_s12 + $0x68] sm:$0xff]  ;;  %v1678_v35 = vld [vmem:[%s1481_s12 + $0xa0] sm:$0xff]  ;;  %s1151_s13 = scalar_lea.vmem %s1829_s9, 16  ;;  %p2056_p0 = scmp.ne.s32.totalorder %s1995_s26, 0 }
  0x65   : > { %v980_v17 = vpop.eup %979  ;;  %999 = vlog2.f32 %v274_v1  ;;  %v1586_v1 = vld [vmem:[%s1474_s8 + $0xb0] sm:$0xff]  ;;  %2017 = vst [vmem:[#allocation32_spill] sm:$0xff] %v1647_v51  ;;  %v1681_v34 = vld [vmem:[%s1481_s12 + $0xa8] sm:$0xff]  ;;  %p1152_p12 = scmp.ne.s32.totalorder %s1829_s9, %s1151_s13  ;;  %s1287_s11 = smov [#allocation8]  }
  0x66   : > { %v982_v20 = vpop.eup %981  ;;  %v498_v30 = vmul.f32 0.6931472, %v980_v17  ;;  %1001 = vlog2.f32 %v478_v26  ;;  %2009 = vst [vmem:[#allocation24_spill] sm:$0xff] %v1586_v1  ;;  %v1603_v26 = vld [vmem:[%s1481_s12 + $0x30] sm:$0xff]  ;;  %v1638_v17 = vld [vmem:[%s1481_s12 + $0x58] sm:$0xff]  ;;  %s1155_s20 = sshll.u32 %s1287_s11, 4  ;;  %s1156_s20 = int_to_ptr.vmem [resolvable:$false] %s1155_s20 }
  0x67   : > { %v984_v23 = vpop.eup %983  ;;  %v500_v31 = vmul.f32 0.6931472, %v982_v20  ;;  %1003 = vlog2.f32 %v479_v27  ;;  %2010 = vst [vmem:[#allocation25_spill] sm:$0xff] %v1603_v26  ;;  %2015 = vst [vmem:[#allocation30_spill] sm:$0xff] %v1638_v17  ;;  %p1153_p2 = pnand %p1152_p12, %p2056_p0  ;;  %s1157_s5 = scalar_lea.vmem %s1156_s20, 32 }
  0x68   : > { %v986_v32 = vpop.eup %985  ;;  %v502_v38 = vmul.f32 0.6931472, %v984_v23  ;;  %v553_v48 = vmax.f32 %v498_v30, -100.0  ;;  %1005 = vlog2.f32 %v480_v33  ;;  %v1600_v23 = vld [vmem:[%s1474_s8 + $0xc0] sm:$0xff]  ;;  %v446_v33 = vsub.f32 1.0, %v1589_v3  ;;  %p1158_p4 = scmp.lt.s32.totalorder %s1829_s9, %s1156_s20  ;;  %p1159_p5 = scmp.lt.s32.totalorder %s1157_s5, %s1151_s13 }
  0x69   : > { %v988_v39 = vpop.eup %987  ;;  %v504_v47 = vmul.f32 0.6931472, %v986_v32  ;;  %v554_v49 = vmax.f32 %v500_v31, -100.0  ;;  %1007 = vlog2.f32 %v481_v37  ;;  %v1635_v37 = vld [vmem:[%s1481_s12 + $0x50] sm:$0xff]  ;;  %p1154_p9 = pneg %p1153_p2 }
  0x6a   : > { %v990_v50 = vpop.eup %989  ;;  %v506_v58 = vmul.f32 0.6931472, %v988_v39  ;;  %v555_v59 = vmax.f32 %v502_v38, -100.0  ;;  %1009 = vlog2.f32 %v482_v44  ;;  %v581_v8 = vmul.f32 %v553_v48, %v441_v42  ;;  %v1611_v42 = vld [vmem:[%s1474_s8 + $0xc8] sm:$0xff]  ;;  %v1617_v44 = vld [vmem:[%s1481_s12 + $0x38] sm:$0xff]  ;;  %2014 = vst [vmem:[#allocation29_spill] sm:$0xff] %v1635_v37  ;;  %p1160_p10 = por %p1159_p5, %p1158_p4 }
  0x6b   : > { %v992_v60 = vpop.eup %991  ;;  %v508_v4 = vmul.f32 0.6931472, %v990_v50  ;;  %v556_v6 = vmax.f32 %v504_v47, -100.0  ;;  %v582_v10 = vmul.f32 %v554_v49, %v442_v43  ;;  %1011 = vlog2.f32 %v483_v52  ;;  %v1614_v43 = vld [vmem:[%s1474_s8 + $0xd0] sm:$0xff]  ;;  %2011 = vst [vmem:[#allocation26_spill] sm:$0xff] %v1617_v44 }
  0x6c   : > { %v994_v12 = vpop.eup %993  ;;  %v510_v27 = vmul.f32 0.6931472, %v992_v60  ;;  %1013 = vlog2.f32 %v484_v53  ;;  %v557_v30 = vmax.f32 %v506_v58, -100.0  ;;  %v583_v31 = vmul.f32 %v555_v59, %v443_v57  ;;  %v1623_v59 = vld [vmem:[%s1474_s8 + $0xd8] sm:$0xff]  ;;  %v1626_v60 = vld [vmem:[%s1481_s12 + $0x40] sm:$0xff]  ;;  %p1161_p11 = pnand %p1160_p10, %p1154_p9 }
  0x6d   : > { %v1594_v20 = vpop.eup %995  ;;  %1015 = vlog2.f32 %v485_v54  ;;  %v512_v47 = vmul.f32 0.6931472, %v994_v12  ;;  %v558_v48 = vmax.f32 %v508_v4, -100.0  ;;  %v584_v49 = vmul.f32 %v556_v6, %v444_v61  ;;  %2012 = vst [vmem:[#allocation27_spill] sm:$0xff] %v1626_v60  ;;  %v1629_v12 = vld [vmem:[%s1481_s12 + $0x48] sm:$0xff] }
  0x6e   : > { %v998_v32 = vpop.eup %997  ;;  %v643_v50 = vadd.f32 %v582_v10, %v581_v8  ;;  %v447_v53 = vsub.f32 1.0, %v1603_v26  ;;  %1017 = vlog2.f32 %v486_v62  ;;  %2013 = vst [vmem:[#allocation28_spill] sm:$0xff] %v1629_v12  ;;  %v559_v4 = vmax.f32 %v510_v27, -100.0 }
  0x6f   : > { %v1608_v39 = vpop.eup %999  ;;  %v514_v61 = vmul.f32 0.6931472, %v998_v32  ;;  %v585_v6 = vmul.f32 %v557_v30, %v445_v14  ;;  %v448_v57 = vsub.f32 1.0, %v1617_v44  ;;  %1019 = vlog2.f32 %v487_v63  ;;  %v1641_v32 = vld [vmem:[%s1481_s12 + $0x60] sm:$0xff]  ;;  %v1664_v44 = vld [vmem:[%s1481_s12 + $0x88] sm:$0xff] }
  0x70   : > { %v1002_v52 = vpop.eup %1001  ;;  %v644_v8 = vadd.f32 %v643_v50, %v583_v31  ;;  %2016 = vst [vmem:[#allocation31_spill] sm:$0xff] %v1641_v32  ;;  %v560_v27 = vmax.f32 %v512_v47, -100.0  ;;  %v586_v30 = vmul.f32 %v558_v48, %v446_v33  ;;  %v449_v54 = vsub.f32 1.0, %v1626_v60 }
  0x71   : > { %v1004_v58 = vpop.eup %1003  ;;  %v516_v14 = vmul.f32 0.6931472, %v1002_v52  ;;  %v450_v62 = vsub.f32 1.0, %v1629_v12  ;;  %1021 = vlog2.f32 %v488_v16  ;;  %v1653_v52 = vld [vmem:[%s1481_s12 + $0x78] sm:$0xff]  ;;  %v561_v33 = vmax.f32 %v514_v61, -100.0 }
  0x72   : > { %v1006_v10 = vpop.eup %1005  ;;  %v645_v31 = vadd.f32 %v644_v8, %v584_v49  ;;  %v518_v47 = vmul.f32 0.6931472, %v1004_v58  ;;  %v587_v48 = vmul.f32 %v559_v4, %v447_v53  ;;  %v451_v12 = vsub.f32 1.0, %v1635_v37  ;;  %v1667_v58 = vld [vmem:[%s1481_s12 + $0x90] sm:$0xff]  ;;  %v1670_v53 = vld [vmem:[%s1481_s12 + $0x98] sm:$0xff] }
  0x73   : > { %v1008_v38 = vpop.eup %1007  ;;  %v452_v63 = vsub.f32 1.0, %v1638_v17  ;;  %v453_v16 = vsub.f32 1.0, %v1641_v32  ;;  %v2018_v60 = vsub.f32 1.0, %v1573_v55  ;;  %v520_v61 = vmul.f32 0.6931472, %v1006_v10  ;;  %v1698_v32 = vld [vmem:[%s1481_s12 + $0xc0] sm:$0xff] }
  0x74   : > { %v1010_v50 = vpop.eup %1009  ;;  %v646_v49 = vadd.f32 %v645_v31, %v585_v6  ;;  %v562_v4 = vmax.f32 %v516_v14, -100.0  ;;  %v588_v6 = vmul.f32 %v560_v27, %v448_v57  ;;  %v454_v17 = vsub.f32 1.0, %v1647_v51 }
  0x75   : > { %v1012_v8 = vpop.eup %1011  ;;  %1023 = vlog2.f32 %v2018_v60  ;;  %v2019_v55 = vsub.f32 1.0, %v1583_v0  ;;  %v522_v10 = vmul.f32 0.6931472, %v1008_v38  ;;  %v563_v14 = vmax.f32 %v518_v47, -100.0  ;;  %v1688_v0 = vld [vmem:[%s1481_s12 + $0xb0] sm:$0xff] }
  0x76   : > { %v1014_v36 = vpop.eup %1013  ;;  %v647_v31 = vadd.f32 %v646_v49, %v586_v30  ;;  %v589_v57 = vmul.f32 %v561_v33, %v449_v54  ;;  %v524_v26 = vmul.f32 0.6931472, %v1010_v50  ;;  %v564_v25 = vmax.f32 %v520_v61, -100.0 }
  0x77   : > { %v1016_v37 = vpop.eup %1015  ;;  %1025 = vlog2.f32 %v2019_v55  ;;  %v1691_v55 = vld [vmem:[%s1481_s12 + $0xb8] sm:$0xff]  ;;  %v590_v38 = vmul.f32 %v562_v4, %v450_v62  ;;  %v2020_v51 = vsub.f32 1.0, %v1586_v1  ;;  %v2021_v60 = vsub.f32 1.0, %v1597_v21 }
  0x78   : > { %v648_v27 = vadd.f32 %v647_v31, %v587_v48  ;;  %v1018_v30 = vpop.eup %1017  ;;  %v526_v31 = vmul.f32 0.6931472, %v1012_v8  ;;  %v565_v50 = vmax.f32 %v522_v10, -100.0  ;;  %v591_v61 = vmul.f32 %v563_v14, %v451_v12  ;;  %v1707_v48 = vld [vmem:[%s1481_s12 + $0xc8] sm:$0xff]  ;;  %v1711_v10 = vld [vmem:[%s1481_s12 + $0xd0] sm:$0xff] }
  0x79   : > { %v1020_v54 = vpop.eup %1019  ;;  %1027 = vlog2.f32 %v2020_v51  ;;  %v528_v33 = vmul.f32 0.6931472, %v1014_v36  ;;  %v2022_v8 = vsub.f32 1.0, %v1600_v23  ;;  %v566_v51 = vmax.f32 %v524_v26, -100.0 }
  0x7a   : > { %v649_v47 = vadd.f32 %v648_v27, %v588_v6  ;;  %1029 = vlog2.f32 %v2021_v60  ;;  %v463_v6 = vsub.f32 1.0, %v1688_v0  ;;  %v464_v27 = vsub.f32 1.0, %v1691_v55 }
  0x7b   : > { %v1022_v4 = vpop.eup %1021  ;;  %1031 = vlog2.f32 %v2022_v8  ;;  %v592_v49 = vmul.f32 %v564_v25, %v452_v63  ;;  %v2023_v14 = vsub.f32 1.0, %v1611_v42  ;;  %v677_v36 = vadd.f32 %v1538_v29, %v1535_v28 }
  0x7c   : > { %v650_v62 = vadd.f32 %v649_v47, %v589_v57  ;;  %1033 = vlog2.f32 %v1490_v2  ;;  %v567_v57 = vmax.f32 %v526_v31, -100.0  ;;  %v530_v47 = vmul.f32 0.6931472, %v1016_v37 }
  0x7d   : > { %1035 = vlog2.f32 %v2023_v14  ;;  %v593_v8 = vmul.f32 %v565_v50, %v453_v16  ;;  %v532_v63 = vmul.f32 0.6931472, %v1018_v30  ;;  %v594_v31 = vmul.f32 %v566_v51, %v454_v17  ;;  %v1728_v50 = vld [vmem:[%s1481_s12 + $0xd8] sm:$0xff] }
  0x7e   : > { %v651_v1 = vadd.f32 %v650_v62, %v590_v38  ;;  %1037 = vlog2.f32 %v1493_v5  ;;  %v2024_v38 = vsub.f32 1.0, %v1614_v43  ;;  %v568_v62 = vmax.f32 %v528_v33, -100.0 }
  0x7f   : > { %v1024_v60 = vpop.eup %1023  ;;  %v534_v37 = vmul.f32 0.6931472, %v1020_v54  ;;  %v536_v16 = vmul.f32 0.6931472, %v1022_v4  ;;  %v678_v5 = vadd.f32 %v677_v36, %v1555_v41  ;;  %v569_v30 = vmax.f32 %v530_v47, -100.0 }
  0x80   : > { %v652_v26 = vadd.f32 %v651_v1, %v591_v61  ;;  %1039 = vlog2.f32 %v2024_v38  ;;  %v2025_v1 = vsub.f32 1.0, %v1623_v59  ;;  %v2026_v61 = vsub.f32 1.0, %v1650_v45 }
  0x81   : > { %v1026_v25 = vpop.eup %1025  ;;  %1041 = vlog2.f32 %v1497_v7  ;;  %v570_v7 = vmax.f32 %v532_v63, -100.0  ;;  %v2027_v54 = vsub.f32 1.0, %v1653_v52  ;;  %v330_v36 = vmul.f32 0.6931472, %v1594_v20 }
  0x82   : > { %v653_v12 = vadd.f32 %v652_v26, %v592_v49  ;;  %1043 = vlog2.f32 %v2025_v1  ;;  %v595_v38 = vmul.f32 %v567_v57, %v2026_v61  ;;  %v538_v49 = vmul.f32 0.6931472, %v1024_v60 }
  0x83   : > { %1045 = vlog2.f32 %v1501_v9  ;;  %v1028_v17 = vpop.eup %1027  ;;  %v540_v51 = vmul.f32 0.6931472, %v1026_v25  ;;  %v596_v4 = vmul.f32 %v568_v62, %v2027_v54  ;;  %v332_v14 = vmul.f32 0.6931472, %v1608_v39 }
  0x84   : > { %v654_v33 = vadd.f32 %v653_v12, %v593_v8  ;;  %v1030_v26 = vpop.eup %1029  ;;  %1047 = vlog2.f32 %v1505_v11  ;;  %v571_v57 = vmax.f32 %v534_v37, -100.0  ;;  %v572_v9 = vmax.f32 %v536_v16, -100.0 }
  0x85   : > { %v1032_v47 = vpop.eup %1031  ;;  %v679_v60 = vadd.f32 %v678_v5, %v1564_v46  ;;  %v542_v25 = vmul.f32 0.6931472, %v1028_v17  ;;  %v2028_v63 = vsub.f32 1.0, %v1656_v40  ;;  %1049 = vlog2.f32 %v1509_v13 }
  0x86   : > { %v655_v1 = vadd.f32 %v654_v33, %v594_v31  ;;  %v1034_v8 = vpop.eup %1033  ;;  %v544_v31 = vmul.f32 0.6931472, %v1030_v26  ;;  %v573_v39 = vmax.f32 %v538_v49, -100.0  ;;  %v2029_v11 = vsub.f32 1.0, %v1664_v44 }
  0x87   : > { %v597_v62 = vmul.f32 %v569_v30, %v2028_v63  ;;  %v1036_v20 = vpop.eup %1035  ;;  %1051 = vlog2.f32 %v1513_v15  ;;  %v574_v16 = vmax.f32 %v540_v51, -100.0  ;;  %v385_v5 = vmax.f32 %v330_v36, -100.0 }
  0x88   : > { %v656_v61 = vadd.f32 %v655_v1, %v595_v38  ;;  %v598_v33 = vmul.f32 %v570_v7, %v2029_v11  ;;  %v1038_v37 = vpop.eup %1037  ;;  %v386_v12 = vmax.f32 %v332_v14, -100.0  ;;  %v2030_v2 = vsub.f32 1.0, %v1667_v58 }
  0x89   : > { %v334_v38 = vmul.f32 0.6931472, %v1034_v8  ;;  %1053 = vlog2.f32 %v1517_v18  ;;  %v680_v13 = vadd.f32 %v679_v60, %v1576_v56  ;;  %v546_v26 = vmul.f32 0.6931472, %v1032_v47 }
  0x8a   : > { %v657_v54 = vadd.f32 %v656_v61, %v596_v4  ;;  %v1040_v17 = vpop.eup %1039  ;;  %v599_v30 = vmul.f32 %v571_v57, %v2030_v2  ;;  %v575_v1 = vmax.f32 %v542_v25, -100.0  ;;  %v2031_v7 = vsub.f32 1.0, %v1670_v53 }
  0x8b   : > { %v1042_v49 = vpop.eup %1041  ;;  %v548_v4 = vmul.f32 0.6931472, %v1036_v20  ;;  %v2032_v14 = vsub.f32 1.0, %v1678_v35  ;;  %v336_v61 = vmul.f32 0.6931472, %v1038_v37  ;;  %1055 = vlog2.f32 %v1520_v19 }
  0x8c   : > { %v600_v15 = vmul.f32 %v572_v9, %v2031_v7  ;;  %v658_v63 = vadd.f32 %v657_v54, %v597_v62  ;;  %v1044_v51 = vpop.eup %1043  ;;  %v576_v57 = vmax.f32 %v544_v31, -100.0  ;;  %v413_v60 = vmul.f32 %v385_v5, %v1535_v28  ;;  %v2034_v54 = vld [vmem:[#allocation15_spill] sm:$0xff] }
  0x8d   : > { %v601_v36 = vmul.f32 %v573_v39, %v2032_v14  ;;  %v1046_v2 = vpop.eup %1045  ;;  %v414_v47 = vmul.f32 %v386_v12, %v1538_v29  ;;  %v338_v8 = vmul.f32 0.6931472, %v1042_v49  ;;  %1057 = vlog2.f32 %v1524_v22 }
  0x8e   : > { %v659_v18 = vadd.f32 %v658_v63, %v598_v33  ;;  %v387_v9 = vmax.f32 %v334_v38, -100.0  ;;  %v681_v25 = vadd.f32 %v680_v13, %v1589_v3  ;;  %v1048_v62 = vpop.eup %1047  ;;  %v550_v20 = vmul.f32 0.6931472, %v1040_v17 }
  0x8f   : > { %v577_v11 = vmax.f32 %v546_v26, -100.0  ;;  %v2033_v39 = vsub.f32 1.0, %v1681_v34  ;;  %v603_v31 = vmul.f32 %v575_v1, %v463_v6  ;;  %v340_v33 = vmul.f32 0.6931472, %v1046_v2  ;;  %v1050_v29 = vpop.eup %1049 }
  0x90   : > { %v660_v19 = vadd.f32 %v659_v18, %v599_v30  ;;  %1059 = vlog2.f32 %v1527_v24  ;;  %v388_v28 = vmax.f32 %v336_v61, -100.0  ;;  %v552_v12 = vmul.f32 0.6931472, %v1044_v51  ;;  %v2036_v51 = vld [vmem:[#allocation16_spill] sm:$0xff] }
  0x91   : > { %v602_v37 = vmul.f32 %v574_v16, %v2033_v39  ;;  %1061 = vlog2.f32 %v2034_v54  ;;  %v609_v5 = vadd.f32 %v414_v47, %v413_v60  ;;  %v1052_v38 = vpop.eup %1051  ;;  %v342_v17 = vmul.f32 0.6931472, %v1048_v62  ;;  %v2035_v16 = vld [vmem:[#allocation25_spill] sm:$0xff]  ;;  %v2043_v54 = vld [vmem:[#allocation19_spill] sm:$0xff] }
  0x92   : > { %v661_v22 = vadd.f32 %v660_v19, %v600_v15  ;;  %v389_v13 = vmax.f32 %v338_v8, -100.0  ;;  %v415_v49 = vmul.f32 %v387_v9, %v1555_v41  ;;  %v682_v30 = vadd.f32 %v681_v25, %v2035_v16  ;;  %v2038_v60 = vld [vmem:[#allocation17_spill] sm:$0xff]  ;;  %v2041_v19 = vld [vmem:[#allocation27_spill] sm:$0xff] }
  0x93   : > { %v578_v26 = vmax.f32 %v548_v4, -100.0  ;;  %v579_v7 = vmax.f32 %v550_v20, -100.0  ;;  %v604_v6 = vmul.f32 %v576_v57, %v464_v27  ;;  %v1054_v1 = vpop.eup %1053  ;;  %v344_v63 = vmul.f32 0.6931472, %v1050_v29  ;;  %v2040_v20 = vld [vmem:[#allocation18_spill] sm:$0xff] }
  0x94   : > { %v662_v24 = vadd.f32 %v661_v22, %v601_v36  ;;  %1063 = vlog2.f32 %v2036_v51  ;;  %v390_v15 = vmax.f32 %v340_v33, -100.0  ;;  %v416_v14 = vmul.f32 %v388_v28, %v1564_v46  ;;  %v2039_v36 = vld [vmem:[#allocation26_spill] sm:$0xff] }
  0x95   : > { %v2037_v61 = vsub.f32 1.0, %v1698_v32  ;;  %v346_v41 = vmul.f32 0.6931472, %v1052_v38  ;;  %1065 = vlog2.f32 %v2038_v60  ;;  %v1056_v4 = vpop.eup %1055  ;;  %v391_v47 = vmax.f32 %v342_v17, -100.0  ;;  %v2044_v17 = vld [vmem:[#allocation28_spill] sm:$0xff]  ;;  %v2049_v60 = vld [vmem:[#allocation21_spill] sm:$0xff] }
  0x96   : > { %v663_v18 = vadd.f32 %v662_v24, %v602_v37  ;;  %v417_v8 = vmul.f32 %v389_v13, %v1576_v56  ;;  %v610_v27 = vadd.f32 %v609_v5, %v415_v49  ;;  %v683_v57 = vadd.f32 %v682_v30, %v2039_v36 }
  0x97   : > { %v605_v2 = vmul.f32 %v577_v11, %v2037_v61  ;;  %v580_v9 = vmax.f32 %v552_v12, -100.0  ;;  %v348_v62 = vmul.f32 0.6931472, %v1054_v1  ;;  %1067 = vlog2.f32 %v2040_v20  ;;  %v1058_v46 = vpop.eup %1057 }
  0x98   : > { %v664_v25 = vadd.f32 %v663_v18, %v603_v31  ;;  %v392_v39 = vmax.f32 %v344_v63, -100.0  ;;  %v418_v11 = vmul.f32 %v390_v15, %v1589_v3  ;;  %v611_v37 = vadd.f32 %v610_v27, %v416_v14  ;;  %v2046_v63 = vld [vmem:[#allocation20_spill] sm:$0xff]  ;;  %v2047_v15 = vld [vmem:[#allocation29_spill] sm:$0xff] }
  0x99   : > { %v684_v33 = vadd.f32 %v683_v57, %v2041_v19  ;;  %v2042_v28 = vsub.f32 1.0, %v1707_v48  ;;  %v350_v56 = vmul.f32 0.6931472, %v1056_v4  ;;  %1069 = vlog2.f32 %v2043_v54  ;;  %v2054_v54 = vld [vmem:[#allocation32_spill] sm:$0xff] }
  0x9a   : > { %v665_v22 = vadd.f32 %v664_v25, %v604_v6  ;;  %v1060_v5 = vpop.eup %1059  ;;  %v393_v12 = vmax.f32 %v346_v41, -100.0  ;;  %v419_v31 = vmul.f32 %v391_v47, %v2035_v16  ;;  %v612_v38 = vadd.f32 %v611_v37, %v417_v8  ;;  %v2050_v8 = vld [vmem:[#allocation30_spill] sm:$0xff] }
  0x9b   : > { %v606_v29 = vmul.f32 %v578_v26, %v2042_v28  ;;  %v685_v13 = vadd.f32 %v684_v33, %v2044_v17  ;;  %v1062_v49 = vpop.eup %1061  ;;  %v2045_v3 = vsub.f32 1.0, %v1711_v10  ;;  %v352_v1 = vmul.f32 0.6931472, %v1058_v46 }
  0x9c   : > { %v666_v24 = vadd.f32 %v665_v22, %v605_v2  ;;  %1071 = vlog2.f32 %v2046_v63  ;;  %v394_v26 = vmax.f32 %v348_v62, -100.0  ;;  %v420_v6 = vmul.f32 %v392_v39, %v2039_v36  ;;  %v2051_v62 = vld [vmem:[#allocation22_spill] sm:$0xff]  ;;  %v2052_v39 = vld [vmem:[#allocation31_spill] sm:$0xff] }
  0x9d   : > { %v607_v30 = vmul.f32 %v579_v7, %v2045_v3  ;;  %v613_v51 = vadd.f32 %v612_v38, %v418_v11  ;;  %v686_v14 = vadd.f32 %v685_v13, %v2047_v15  ;;  %v2048_v61 = vsub.f32 1.0, %v1728_v50  ;;  %v2055_v13 = vld [vmem:[#allocation24_spill] sm:$0xff] }
  0x9e   : > { %v667_v18 = vadd.f32 %v666_v24, %v606_v29  ;;  %v354_v41 = vmul.f32 0.6931472, %v1060_v5  ;;  %1073 = vlog2.f32 %v2049_v60  ;;  %v1064_v4 = vpop.eup %1063  ;;  %v395_v47 = vmax.f32 %v350_v56, -100.0  ;;  %v2053_v29 = vld [vmem:[#allocation23_spill] sm:$0xff] }
  0x9f   : > { %v608_v16 = vmul.f32 %v580_v9, %v2048_v61  ;;  %v421_v7 = vmul.f32 %v393_v12, %v2041_v19  ;;  %v614_v2 = vadd.f32 %v613_v51, %v419_v31  ;;  %v687_v27 = vadd.f32 %v686_v14, %v2050_v8  ;;  %v1066_v57 = vpop.eup %1065 }
  0xa0   : > { %v668_v25 = vadd.f32 %v667_v18, %v607_v30  ;;  %v356_v36 = vmul.f32 0.6931472, %v1062_v49  ;;  %1075 = vlog2.f32 %v2051_v62  ;;  %v396_v20 = vmax.f32 %v352_v1, -100.0 }
  0xa1   : > { %v422_v46 = vmul.f32 %v394_v26, %v2044_v17  ;;  %v615_v9 = vadd.f32 %v614_v2, %v420_v6  ;;  %v688_v11 = vadd.f32 %v687_v27, %v2052_v39  ;;  %v1068_v37 = vpop.eup %1067  ;;  %v358_v28 = vmul.f32 0.6931472, %v1064_v4 }
  0xa2   : > { %v669_v33 = vadd.f32 %v668_v25, %v608_v16  ;;  %1077 = vlog2.f32 %v2053_v29  ;;  %v397_v19 = vmax.f32 %v354_v41, -100.0  ;;  %v423_v22 = vmul.f32 %v395_v47, %v2047_v15 }
  0xa3   : > { %v616_v56 = vadd.f32 %v615_v9, %v421_v7  ;;  %v689_v5 = vadd.f32 %v688_v11, %v2054_v54  ;;  %v1070_v12 = vpop.eup %1069  ;;  %v360_v38 = vmul.f32 0.6931472, %v1066_v57  ;;  %1079 = vlog2.f32 %v2055_v13 }
  0xa4   : > { %v670_v31 = vrot.slane %v669_v33, 4  ;;  %v398_v17 = vmax.f32 %v356_v36, -100.0  ;;  %v424_v49 = vmul.f32 %v396_v20, %v2050_v8  ;;  %v362_v63 = vmul.f32 0.6931472, %v1068_v37 }
  0xa5   : > { %v617_v3 = vadd.f32 %v616_v56, %v422_v46  ;;  %v690_v30 = vadd.f32 %v689_v5, %v1650_v45  ;;  %1081 = vlog2.f32 %v1597_v21  ;;  %v399_v26 = vmax.f32 %v358_v28, -100.0 }
  0xa6   : > { %v1072_v24 = vpop.eup %1071  ;;  %v671_v1 = vadd.f32 %v670_v31, %v669_v33  ;;  %v425_v6 = vmul.f32 %v397_v19, %v2052_v39  ;;  %v364_v16 = vmul.f32 0.6931472, %v1070_v12  ;;  %1083 = vlog2.f32 %v1600_v23 }
  0xa7   : > { %v618_v51 = vadd.f32 %v617_v3, %v423_v22  ;;  %v691_v15 = vadd.f32 %v690_v30, %v1653_v52  ;;  %v400_v18 = vmax.f32 %v360_v38, -100.0  ;;  %v426_v41 = vmul.f32 %v398_v17, %v2054_v54 }
  0xa8   : > { %v1074_v14 = vpop.eup %1073  ;;  %v672_v61 = vrot.slane %v671_v1, 2  ;;  %v1809_v7 = vmul.f32 0.6931472, %v1072_v24  ;;  %1085 = vlog2.f32 %v1611_v42  ;;  %v401_v2 = vmax.f32 %v362_v63, -100.0 }
  0xa9   : > { %v619_v60 = vadd.f32 %v618_v51, %v424_v49  ;;  %v692_v21 = vadd.f32 %v691_v15, %v1656_v40  ;;  %v427_v8 = vmul.f32 %v399_v26, %v1650_v45  ;;  %v368_v36 = vmul.f32 0.6931472, %v1074_v14 }
  0xaa   : > { %v1076_v4 = vpop.eup %1075  ;;  %v673_v47 = vadd.f32 %v672_v61, %v671_v1  ;;  %1087 = vlog2.f32 %v1614_v43  ;;  %v402_v62 = vmax.f32 %v364_v16, -100.0  ;;  %v428_v42 = vmul.f32 %v400_v18, %v1653_v52 }
  0xab   : > { %v620_v27 = vadd.f32 %v619_v60, %v425_v6  ;;  %v693_v57 = vadd.f32 %v692_v21, %v1664_v44  ;;  %v370_v39 = vmul.f32 0.6931472, %v1076_v4  ;;  %1089 = vlog2.f32 %v1623_v59 }
  0xac   : > { %v1078_v23 = vpop.eup %1077  ;;  %v674_v25 = vrot.slane %v673_v47, 1  ;;  %v403_v43 = vmax.f32 %v1809_v7, -100.0  ;;  %v429_v52 = vmul.f32 %v401_v2, %v1656_v40  ;;  %v404_v28 = vmax.f32 %v368_v36, -100.0 }
  0xad   : > { %v621_v20 = vadd.f32 %v620_v27, %v426_v41  ;;  %v694_v46 = vadd.f32 %v693_v57, %v1667_v58  ;;  %v1080_v45 = vpop.eup %1079  ;;  %v372_v59 = vmul.f32 0.6931472, %v1078_v23  ;;  %v430_v29 = vmul.f32 %v402_v62, %v1664_v44 }
  0xae   : > { %v675_v9 = vadd.f32 %v674_v25, %v673_v47 }
  0xaf   : > { %v622_v11 = vadd.f32 %v621_v20, %v427_v8  ;;  %v695_v37 = vadd.f32 %v694_v46, %v1670_v53  ;;  %v1082_v33 = vpop.eup %1081 }
  0xb0   : > { %676 = vst [vmem:[%s264_s23] sm:$0x1] %v675_v9 }
  0xb1   : > { %v623_v19 = vadd.f32 %v622_v11, %v428_v42  ;;  %v696_v22 = vadd.f32 %v695_v37, %v1678_v35 }
  0xb2   : > { %1164 = shalt.err (!%p1161_p11)
}
  0xb3   : > { %s1165_s19 = scalar_lea.hbm %s1827_s6, 16  ;;  %s1169_s28 = scalar_lea.hbm %s1963_s3, 64 }
  0xb4   : > { %p1166_p7 = scmp.ne.s32.totalorder %s1827_s6, %s1165_s19  ;;  %p1170_p1 = scmp.lt.u32.totalorder %s1827_s6, %s1963_s3 }
  0xb5   : > { %p1171_p3 = scmp.lt.u32.totalorder %s1169_s28, %s1165_s19  ;;  %p1173_p12 = scmp.lt.u32.totalorder %s1165_s19, %s1827_s6 }
  0xb6   : > { %p1167_p8 = pnand %p1166_p7, %p2056_p0 }
  0xb7   : > { %p1172_p6 = por %p1171_p3, %p1170_p1 }
  0xb8   : > { %p1168_p13 = pneg %p1167_p8 }
  0xb9   : > { %p1174_p2 = por %p1173_p12, %p1172_p6 }
  0xbb   : > { %p1175_p9 = pnand %p1174_p2, %p1168_p13 }
  0xbd   : > { %1178 = shalt.err (!%p1175_p9)
}
  0xbe   : > { %921 = dma.vmem_to_hbm [thread:$0]  (%p2056_p0), %s1829_s9, 16, %s1827_s6, %s1838_s30   ;;  %v1084_v40 = vpop.eup %1083  ;;  %v374_v44 = vmul.f32 0.6931472, %v1080_v45  ;;  %v405_v56 = vmax.f32 %v370_v39, -100.0  ;;  %v431_v54 = vmul.f32 %v403_v43, %v1667_v58  ;;  %v624_v5 = vadd.f32 %v623_v19, %v429_v52 }
  0xbf   : > { %v697_v12 = vadd.f32 %v696_v22, %v1681_v34  ;;  %v1086_v31 = vpop.eup %1085  ;;  %v376_v38 = vmul.f32 0.6931472, %v1082_v33  ;;  %v406_v13 = vmax.f32 %v372_v59, -100.0  ;;  %v432_v17 = vmul.f32 %v404_v28, %v1670_v53  ;;  %s270_s23 = scalar_lea.vmem [#allocation10], %s1470_s10  ;;  %s1884_s6 = scalar_lea.hbm %s1964_s4, %s1816_s22 }
  0xc0   : > { %v625_v49 = vadd.f32 %v624_v5, %v430_v29  ;;  %v1088_v30 = vpop.eup %1087  ;;  %v378_v24 = vmul.f32 0.6931472, %v1084_v40  ;;  %v407_v1 = vmax.f32 %v374_v44, -100.0  ;;  %v433_v63 = vmul.f32 %v405_v56, %v1678_v35  ;;  %s758_s9 = sshll.u32 %s270_s23, 4  ;;  %s1288_s11 = smov [#allocation10]   ;;  %s1886_s9 = int_to_ptr.vmem [resolvable:$true] %s758_s9 }
  0xc1   : > { %v698_v3 = vadd.f32 %v697_v12, %v1688_v0  ;;  %v1090_v58 = vpop.eup %1089  ;;  %v380_v51 = vmul.f32 0.6931472, %v1086_v31  ;;  %v408_v15 = vmax.f32 %v376_v38, -100.0  ;;  %v434_v14 = vmul.f32 %v406_v13, %v1681_v34  ;;  %s1179_s13 = scalar_lea.vmem %s1886_s9, 16  ;;  %s1183_s20 = sshll.u32 %s1288_s11, 4  ;;  %s1184_s20 = int_to_ptr.vmem [resolvable:$false] %s1183_s20 }
  0xc2   : > { %v626_v26 = vadd.f32 %v625_v49, %v431_v54  ;;  %v382_v53 = vmul.f32 0.6931472, %v1088_v30  ;;  %v409_v18 = vmax.f32 %v378_v24, -100.0  ;;  %v435_v41 = vmul.f32 %v407_v1, %v1688_v0  ;;  %p1180_p4 = scmp.ne.s32.totalorder %s1886_s9, %s1179_s13  ;;  %s1185_s5 = scalar_lea.vmem %s1184_s20, 32 }
  0xc3   : > { %v699_v6 = vadd.f32 %v698_v3, %v1691_v55  ;;  %v384_v4 = vmul.f32 0.6931472, %v1090_v58  ;;  %v410_v35 = vmax.f32 %v380_v51, -100.0  ;;  %v436_v47 = vmul.f32 %v408_v15, %v1691_v55  ;;  %p1186_p11 = scmp.lt.s32.totalorder %s1886_s9, %s1184_s20  ;;  %p1187_p7 = scmp.lt.s32.totalorder %s1185_s5, %s1179_s13 }
  0xc4   : > { %v627_v61 = vadd.f32 %v626_v26, %v432_v17  ;;  %v411_v8 = vmax.f32 %v382_v53, -100.0  ;;  %v437_v34 = vmul.f32 %v409_v18, %v1698_v32  ;;  %p1181_p5 = pnand %p1180_p4, %p2056_p0 }
  0xc5   : > { %v700_v16 = vadd.f32 %v699_v6, %v1698_v32  ;;  %v412_v23 = vmax.f32 %v384_v4, -100.0  ;;  %v438_v0 = vmul.f32 %v410_v35, %v1707_v48  ;;  %p1188_p8 = por %p1187_p7, %p1186_p11 }
  0xc6   : > { %v628_v60 = vadd.f32 %v627_v61, %v433_v63  ;;  %v439_v62 = vmul.f32 %v411_v8, %v1711_v10  ;;  %p1182_p10 = pneg %p1181_p5 }
  0xc7   : > { %v701_v21 = vadd.f32 %v700_v16, %v1707_v48  ;;  %v440_v20 = vmul.f32 %v412_v23, %v1728_v50 }
  0xc8   : > { %v629_v7 = vadd.f32 %v628_v60, %v434_v14  ;;  %p1189_p13 = pnand %p1188_p8, %p1182_p10 }
  0xc9   : > { %v702_v2 = vadd.f32 %v701_v21, %v1711_v10 }
  0xca   : > { %v630_v27 = vadd.f32 %v629_v7, %v435_v41 }
  0xcb   : > { %v703_v57 = vadd.f32 %v702_v2, %v1728_v50 }
  0xcc   : > { %v631_v25 = vadd.f32 %v630_v27, %v436_v47 }
  0xcd   : > { %v704_v36 = vrot.slane %v703_v57, 4 }
  0xce   : > { %v632_v42 = vadd.f32 %v631_v25, %v437_v34 }
  0xcf   : > { %v705_v55 = vadd.f32 %v704_v36, %v703_v57 }
  0xd0   : > { %v633_v46 = vadd.f32 %v632_v42, %v438_v0 }
  0xd1   : > { %v706_v45 = vrot.slane %v705_v55, 2 }
  0xd2   : > { %v634_v9 = vadd.f32 %v633_v46, %v439_v62 }
  0xd3   : > { %v707_v32 = vadd.f32 %v706_v45, %v705_v55 }
  0xd4   : > { %v635_v39 = vadd.f32 %v634_v9, %v440_v20 }
  0xd5   : > { %v708_v43 = vrot.slane %v707_v32, 1 }
  0xd6   : > { %v636_v52 = vrot.slane %v635_v39, 4 }
  0xd7   : > { %v709_v48 = vadd.f32 %v708_v43, %v707_v32 }
  0xd8   : > { %v637_v10 = vadd.f32 %v636_v52, %v635_v39 }
  0xd9   : > { %710 = vst [vmem:[%s270_s23] sm:$0x1] %v709_v48 }
  0xda   : > { %1192 = shalt.err (!%p1189_p13)
}
  0xdb   : > { %s1193_s19 = scalar_lea.hbm %s1884_s6, 16  ;;  %s1197_s28 = scalar_lea.hbm %s1964_s4, 64 }
  0xdc   : > { %p1194_p1 = scmp.ne.s32.totalorder %s1884_s6, %s1193_s19  ;;  %p1198_p12 = scmp.lt.u32.totalorder %s1884_s6, %s1964_s4 }
  0xdd   : > { %p1199_p2 = scmp.lt.u32.totalorder %s1197_s28, %s1193_s19  ;;  %p1201_p4 = scmp.lt.u32.totalorder %s1193_s19, %s1884_s6 }
  0xde   : > { %p1195_p3 = pnand %p1194_p1, %p2056_p0 }
  0xdf   : > { %p1200_p9 = por %p1199_p2, %p1198_p12 }
  0xe0   : > { %p1196_p6 = pneg %p1195_p3 }
  0xe1   : > { %p1202_p5 = por %p1201_p4, %p1200_p9 }
  0xe3   : > { %p1203_p10 = pnand %p1202_p5, %p1196_p6 }
  0xe5   : > { %1206 = shalt.err (!%p1203_p10)
}
  0xe6   : > { %922 = dma.vmem_to_hbm [thread:$0]  (%p2056_p0), %s1886_s9, 16, %s1884_s6, %s1838_s30   ;;  %v638_v50 = vrot.slane %v637_v10, 2 }
  0xe7   : > { %s258_s23 = scalar_lea.vmem [#allocation7], %s1470_s10  ;;  %s1915_s11 = scalar_lea.hbm %s1962_s2, %s1816_s22 }
  0xe8   : > { %v639_v11 = vadd.f32 %v638_v50, %v637_v10  ;;  %s732_s14 = sshll.u32 %s258_s23, 4  ;;  %s712_s20 = scalar_lea.sflag [#allocation4], %s1470_s10  ;;  %s1917_s14 = int_to_ptr.vmem [resolvable:$true] %s732_s14 }
  0xe9   : > { %s1207_s5 = scalar_lea.vmem %s1917_s14, 16  ;;  %s1289_s30 = smov [#allocation7]  }
  0xea   : > { %v640_v37 = vrot.slane %v639_v11, 1  ;;  %p1208_p11 = scmp.ne.s32.totalorder %s1917_s14, %s1207_s5  ;;  %s1211_s9 = sshll.u32 %s1289_s30, 4  ;;  %s1212_s9 = int_to_ptr.vmem [resolvable:$false] %s1211_s9 }
  0xeb   : > { %s1213_s6 = scalar_lea.vmem %s1212_s9, 32  ;;  %p1214_p13 = scmp.lt.s32.totalorder %s1917_s14, %s1212_s9 }
  0xec   : > { %v641_v33 = vadd.f32 %v640_v37, %v639_v11  ;;  %p1209_p7 = pnand %p1208_p11, %p2056_p0  ;;  %p1215_p1 = scmp.lt.s32.totalorder %s1213_s6, %s1207_s5 }
  0xee   : > { %642 = vst [vmem:[%s258_s23] sm:$0x1] %v641_v33  ;;  %p1210_p8 = pneg %p1209_p7  ;;  %p1216_p3 = por %p1215_p1, %p1214_p13 }
  0xf0   : > { %p1217_p6 = pnand %p1216_p3, %p1210_p8 }
  0xf2   : > { %1220 = shalt.err (!%p1217_p6)
}
  0xf3   : > { %s1221_s10 = scalar_lea.hbm %s1915_s11, 16  ;;  %s1225_s29 = scalar_lea.hbm %s1962_s2, 64 }
  0xf4   : > { %p1222_p12 = scmp.ne.s32.totalorder %s1915_s11, %s1221_s10  ;;  %p1226_p4 = scmp.lt.u32.totalorder %s1915_s11, %s1962_s2 }
  0xf5   : > { %p1227_p5 = scmp.lt.u32.totalorder %s1225_s29, %s1221_s10  ;;  %p1229_p11 = scmp.lt.u32.totalorder %s1221_s10, %s1915_s11 }
  0xf6   : > { %p1223_p2 = pnand %p1222_p12, %p2056_p0 }
  0xf7   : > { %p1228_p10 = por %p1227_p5, %p1226_p4 }
  0xf8   : > { %p1224_p9 = pneg %p1223_p2 }
  0xf9   : > { %p1230_p7 = por %p1229_p11, %p1228_p10 }
  0xfb   : > { %p1231_p8 = pnand %p1230_p7, %p1224_p9 }
  0xfd   : > { %1234 = shalt.err (!%p1231_p8)
}
  0xfe   : > { %920 = dma.vmem_to_hbm [thread:$0]  (%p2056_p0), %s1917_s14, 16, %s1915_s11, %s712_s20  }
  0xff PF: > { %p944_p13 = scmp.ge.s32.totalorder %s1281_s18, 2  ;;  %s770_s12 = sand.u32 1, %s1269_s15  }
 0x100   : > { %p2057_p1 = scmp.ne.s32.totalorder %s1996_s27, 0  ;;  %s771_s25 = scalar_lea.sflag [#allocation4], %s770_s12 }
 0x102   : > { %p934_p3 = pnand %p944_p13, %p2057_p1 }
 0x104   : > { %1260 = dma.done.wait (!%p934_p3), %s771_s25, 16  }
 0x105   : > { %1262 = vsyncadd (!%p934_p3), %s771_s25, 4294967280  ;;  %s2058_s23 = sadd.s32 4294967294, %s1281_s18  }
 0x106   : > { %s778_s7 = sand.u32 1, %s2058_s23  }
 0x107   : > { %s779_s13 = scalar_lea.sflag [#allocation9], %s778_s7 }
 0x108   : > { %1264 = dma.done.wait (!%p934_p3), %s779_s13, 32  }
 0x109   : > { %1266 = vsyncadd (!%p934_p3), %s779_s13, 4294967264  ;;  %p24_p0 = scmp.ge.s32.totalorder %s1340_s21, 6   ;;  %s2059_s15 = smov %s1273_s16 }
 0x10a   : > { %s2060_s16 = smov %s1277_s17  ;;  %s2061_s17 = smov %s1352_s24 }
 0x10b   : > { %s2062_s18 = smov %s1340_s21  ;;  %26 = sbr.rel (!%p24_p0) target bundleno = 9 (0x9), region = 118 }
 0x112   :  { %791 = vsyncpa [#allocation3], 1 }
 0x113   :  { %793 = vsyncpa [#allocation3 + $0x1], 1 }
 0x114   :  { %794 = vsyncpa [#allocation6], 1 }
 0x115   :  { %796 = vsyncpa [#allocation6 + $0x1], 1 }
 0x116   :  { %797 = vsyncpa [#allocation4], 1 }
 0x117   :  { %799 = vsyncpa [#allocation4 + $0x1], 1 }
 0x118   :  { %800 = vsyncpa [#allocation9], 1 }
 0x119   :  { %802 = vsyncpa [#allocation9 + $0x1], 1 }

</bundles_post_ra>
